<compile_context>
chip_gen: v6e
topology: v6e:2x2x1
jax: 0.10.0
libtpu: 0.0.40
codegen_flags: <defaults>
</compile_context>

<pallas_src>
import math

import numpy as np
import jax
import jax.numpy as jnp
from jax.experimental import pallas as pl
from jax.experimental.pallas import tpu as pltpu


# ---------------------------------------------------------------------------
# Host-side glue: build the separable linear maps for `resample` (vectorized).
# ---------------------------------------------------------------------------
def _sinc_np(x):
    x = np.asarray(x, dtype=np.float64)
    safe = np.where(x == 0.0, 1.0, x)
    return np.where(x == 0.0, 1.0, np.sin(np.pi * safe) / (np.pi * safe))


def _lanczos_np(x, a):
    cond = np.logical_and(-a < x, x < a)
    out = np.where(cond, _sinc_np(x) * _sinc_np(x / a), 0.0)
    return out / out.sum()


def _ramp_np(ratio, width):
    n = math.ceil(width / ratio + 1)
    out = np.arange(n, dtype=np.float64) * ratio
    return np.concatenate([-out[1:][::-1], out])[1:-1]


def _lanczos_conv_matrix(size, dsize):
    """(size, size) matrix == reflect-pad + 1-D lanczos conv (as in resample)."""
    k = _lanczos_np(_ramp_np(dsize / size, 2), 2)
    klen = k.shape[0]
    pad = (klen - 1) // 2
    r = np.arange(size)[:, None]
    t = np.arange(klen)[None, :]
    idx = r + t - pad
    idx = np.where(idx < 0, -idx, idx)                       # 'reflect' (no edge repeat)
    idx = np.where(idx >= size, 2 * (size - 1) - idx, idx)
    L = np.zeros((size, size), dtype=np.float64)
    np.add.at(L, (np.broadcast_to(r, idx.shape), idx),
              np.broadcast_to(k[None, :], idx.shape))
    return L


def _bicubic_matrix(dsize, size):
    """(dsize, size) matrix == F.interpolate(..., 'bicubic', align_corners=True)."""
    A = -0.75

    def c1(x):
        return ((A + 2.0) * x - (A + 3.0)) * x * x + 1.0

    def c2(x):
        return ((A * x - 5.0 * A) * x + 8.0 * A) * x - 4.0 * A

    B = np.zeros((dsize, size), dtype=np.float64)
    scale = (size - 1) / (dsize - 1) if dsize > 1 else 0.0
    src = np.arange(dsize, dtype=np.float64) * scale
    i0 = np.floor(src).astype(np.int64)
    t = src - i0
    w = np.stack([c2(t + 1.0), c1(t), c1(1.0 - t), c2(2.0 - t)], axis=1)   # (dsize, 4)
    idx = np.clip(i0[:, None] + np.arange(-1, 3)[None, :], 0, size - 1)
    rows = np.broadcast_to(np.arange(dsize)[:, None], idx.shape)
    np.add.at(B, (rows, idx), w)
    return B


_RESAMPLE_CORE_CACHE = {}


def _resample_core(size, cut_size):
    """(cut_size, size): (lanczos if downsampling) then bicubic. Cached."""
    cache_key = (size, cut_size)
    M = _RESAMPLE_CORE_CACHE.get(cache_key)
    if M is None:
        M = _bicubic_matrix(cut_size, size)
        if cut_size < size:
            M = M @ _lanczos_conv_matrix(size, cut_size)
        _RESAMPLE_CORE_CACHE[cache_key] = M
    return M


def _cutout_matrix(side, offset, size, cut_size):
    """(cut_size, side): crop [offset:offset+size] folded with the resample core."""
    M = np.zeros((cut_size, side), dtype=np.float64)
    M[:, offset:offset + size] = _resample_core(size, cut_size)
    return M


# ---------------------------------------------------------------------------
# Pallas kernel: one cutout per grid step, all channels in the block.
# ---------------------------------------------------------------------------
def _build_cutout_kernel(num_planes, cut_size):
    cs = cut_size

    def kernel(fac_ref, mh_ref, mwt_ref, x_ref, noise_ref, out_ref, u_ref):
        i = pl.program_id(0)
        mwt = mwt_ref[0]                                    # (W, cs) bf16
        # Stage 1: per-channel W-contraction (M = H, nice and fat); pack the
        # per-channel results along lanes into the bf16 scratch u: (H, C*cs).
        for b in range(num_planes):                         # static unroll (C is small)
            u = jnp.dot(x_ref[b], mwt, preferred_element_type=jnp.float32)
            u_ref[:, b * cs:(b + 1) * cs] = u.astype(jnp.bfloat16)
        # Stage 2: one fat matmul over H: (cs, H) @ (H, C*cs) -> (cs, C*cs).
        r = jnp.dot(mh_ref[0], u_ref[...], preferred_element_type=jnp.float32)
        # VPU epilogue: per-cutout noise, single lane-dense store.
        out_ref[0] = r + fac_ref[i] * noise_ref[0]

    return kernel


def _vmem_limit_bytes(B, H, W, cs):
    # Rough per-step live-set estimate (2 buffers for every pipelined block).
    est = (2 * B * H * W * 2            # x (bf16) -- resident, budget 2 to be safe
           + 2 * cs * H * 2             # M_h block (bf16)
           + 2 * W * cs * 2             # M_w^T block (bf16)
           + 2 * cs * B * cs * 4        # noise block (f32)
           + 2 * cs * B * cs * 4        # out block (f32)
           + H * B * cs * 2)            # u scratch (bf16)
    return int(min(max(2 * est + (4 << 20), 16 << 20), 48 << 20))


def make_cutouts(x, cut_size, cutn, cut_pow=1.0, noise_fac=0.1, *,
                 key, geom_seed=0, return_reference=False):
    """Forward pass of MakeCutouts (kornia augs skipped - see TODO above)."""
    N, C, H, W = x.shape
    assert N == 1, "noise-fac broadcasting in the reference module requires batch == 1"
    B = N * C
    cs = cut_size
    max_size = min(W, H)
    min_size = min(W, H, cut_size)

    # --- cutout geometry: host RNG, no device->host sync -------------------
    rng = np.random.default_rng(geom_seed)
    sizes, offx, offy = [], [], []
    for _ in range(cutn):
        size = int(rng.random() ** cut_pow * (max_size - min_size) + min_size)
        sizes.append(size)
        offx.append(int(rng.integers(0, W - size + 1)))
        offy.append(int(rng.integers(0, H - size + 1)))

    mh_np = np.stack([_cutout_matrix(H, offy[i], sizes[i], cs) for i in range(cutn)])
    mw_np = np.stack([_cutout_matrix(W, offx[i], sizes[i], cs) for i in range(cutn)])
    mh = jnp.asarray(mh_np, jnp.bfloat16)                              # (cutn, cs, H)
    mwt = jnp.asarray(np.transpose(mw_np, (0, 2, 1)), jnp.bfloat16)    # (cutn, W, cs)

    # --- device-side randomness (stays in the jax graph) --------------------
    k_fac, k_noise = jax.random.split(key)
    facs = jax.random.uniform(k_fac, (cutn,), minval=0.0, maxval=noise_fac,
                              dtype=jnp.float32)
    # noise laid out exactly like the kernel output block: (cutn, cs, C*cs)
    noise = jax.random.normal(k_noise, (cutn, cs, B * cs), dtype=jnp.float32)

    x_flat = x.reshape(B, H, W).astype(jnp.bfloat16)

    kernel = _build_cutout_kernel(B, cs)

    out = pl.pallas_call(
        kernel,
        out_shape=jax.ShapeDtypeStruct((cutn, cs, B * cs), jnp.float32),
        grid=(cutn,),
        in_specs=[
            pl.BlockSpec(memory_space=pltpu.MemorySpace.SMEM),          # facs (cutn,)
            pl.BlockSpec((1, cs, H), lambda i: (i, 0, 0)),              # M_h
            pl.BlockSpec((1, W, cs), lambda i: (i, 0, 0)),              # M_w^T
            pl.BlockSpec((B, H, W), lambda i: (0, 0, 0)),               # x, resident
            pl.BlockSpec((1, cs, B * cs), lambda i: (i, 0, 0)),         # noise
        ],
        out_specs=pl.BlockSpec((1, cs, B * cs), lambda i: (i, 0, 0)),
        scratch_shapes=[pltpu.VMEM((H, B * cs), jnp.bfloat16)],
        compiler_params=pltpu.CompilerParams(
            dimension_semantics=("parallel",),                # shards cutn over 2 TCs on v7x
            vmem_limit_bytes=_vmem_limit_bytes(B, H, W, cs)),
    )(facs, mh, mwt, x_flat, noise)

    # (cutn, cs, C*cs) -> (cutn*N, C, cs, cs)  (torch.cat(cutouts, dim=0) order)
    result = jnp.transpose(out.reshape(cutn, cs, B, cs), (0, 2, 1, 3))
    result = result.reshape(cutn * N, C, cs, cs)

    if not return_reference:
        return result

    # --- pure-JAX reference of the same math (test/debug only, off the hot path)
    t = jnp.einsum("bhw,iwp->ibhp", x_flat, mwt,
                   preferred_element_type=jnp.float32).astype(jnp.bfloat16)
    r = jnp.einsum("iqh,ibhp->ibqp", mh, t, preferred_element_type=jnp.float32)
    noise_r = jnp.transpose(noise.reshape(cutn, cs, B, cs), (0, 2, 1, 3))
    ref = r + facs[:, None, None, None] * noise_r
    ref = ref.reshape(cutn * N, C, cs, cs)
    return result, ref


if __name__ == "__main__":
    key = jax.random.PRNGKey(0)
    k_in, k_fwd = jax.random.split(key)

    N, C, H, W = 1, 4, 16, 16
    cut_size, cutn = 8, 4
    x = jax.random.normal(k_in, (N, C, H, W), dtype=jnp.float32)

    out, ref = make_cutouts(x, cut_size=cut_size, cutn=cutn, cut_pow=1.0,
                            noise_fac=0.1, key=k_fwd, geom_seed=0,
                            return_reference=True)
    out = jax.block_until_ready(out)

    assert out.shape == (cutn * N, C, cut_size, cut_size)
    np.testing.assert_allclose(np.asarray(out), np.asarray(ref), rtol=2e-2, atol=2e-2)
    print("KERNEL_OK")
</pallas_src>

<mosaic_0001>
module attributes {stable_mosaic.version = 11 : i64} {
  func.func @kernel(%arg0: i32, %arg1: memref<4xf32, #tpu.memory_space<smem>>, %arg2: memref<1x8x16xbf16, #tpu.memory_space<vmem>>, %arg3: memref<1x16x8xbf16, #tpu.memory_space<vmem>>, %arg4: memref<4x16x16xbf16, #tpu.memory_space<vmem>>, %arg5: memref<1x8x32xf32, #tpu.memory_space<vmem>>, %arg6: memref<1x8x32xf32, #tpu.memory_space<vmem>>, %arg7: memref<16x32xbf16, #tpu.memory_space<vmem>>) attributes {dimension_semantics = [#tpu.dimension_semantics<parallel>], iteration_bounds = array<i64: 4>, scalar_prefetch = 0 : i64, scratch_operands = 1 : i64, tpu.core_type = #tpu.core_type<tc>, window_params = [{transform_indices = @transform_0, window_bounds = array<i64: 4>}, {transform_indices = @transform_1, window_bounds = array<i64: 1, 8, 16>}, {transform_indices = @transform_2, window_bounds = array<i64: 1, 16, 8>}, {pipeline_mode = #tpu.pipeline_mode<synchronous>, transform_indices = @transform_3, window_bounds = array<i64: 4, 16, 16>}, {transform_indices = @transform_4, window_bounds = array<i64: 1, 8, 32>}, {transform_indices = @transform_5, window_bounds = array<i64: 1, 8, 32>}]} {
    %c0 = arith.constant 0 : index
    %c0_0 = arith.constant 0 : index
    %c0_1 = arith.constant 0 : index
    %0 = vector.load %arg3[%c0, %c0_0, %c0_1] : memref<1x16x8xbf16, #tpu.memory_space<vmem>>, vector<1x16x8xbf16>
    %1 = vector.shape_cast %0 : vector<1x16x8xbf16> to vector<16x8xbf16>
    %c0_2 = arith.constant 0 : index
    %c0_3 = arith.constant 0 : index
    %c0_4 = arith.constant 0 : index
    %2 = vector.load %arg4[%c0_2, %c0_3, %c0_4] : memref<4x16x16xbf16, #tpu.memory_space<vmem>>, vector<1x16x16xbf16>
    %3 = vector.shape_cast %2 : vector<1x16x16xbf16> to vector<16x16xbf16>
    %cst = arith.constant dense<0.000000e+00> : vector<16x8xf32>
    %4 = tpu.matmul %3, %1, %cst {dimension_numbers = #tpu.dot_dimension_numbers<[1], [0], [0], [1], [0, 0, 1, 1], [], []>} : vector<16x16xbf16>, vector<16x8xbf16>, vector<16x8xf32> -> vector<16x8xf32>
    %5 = arith.truncf %4 : vector<16x8xf32> to vector<16x8xbf16>
    %c0_5 = arith.constant 0 : index
    %c0_6 = arith.constant 0 : index
    %6 = vector.load %arg7[%c0_5, %c0_6] : memref<16x32xbf16, #tpu.memory_space<vmem>>, vector<16x8xbf16>
    tpu.vector_store %arg7[%c0_5, %c0_6], %5 {strides = array<i32>} : memref<16x32xbf16, #tpu.memory_space<vmem>>, vector<16x8xbf16>,
    %c1 = arith.constant 1 : index
    %c0_7 = arith.constant 0 : index
    %c0_8 = arith.constant 0 : index
    %7 = vector.load %arg4[%c1, %c0_7, %c0_8] : memref<4x16x16xbf16, #tpu.memory_space<vmem>>, vector<1x16x16xbf16>
    %8 = vector.shape_cast %7 : vector<1x16x16xbf16> to vector<16x16xbf16>
    %cst_9 = arith.constant dense<0.000000e+00> : vector<16x8xf32>
    %9 = tpu.matmul %8, %1, %cst_9 {dimension_numbers = #tpu.dot_dimension_numbers<[1], [0], [0], [1], [0, 0, 1, 1], [], []>} : vector<16x16xbf16>, vector<16x8xbf16>, vector<16x8xf32> -> vector<16x8xf32>
    %10 = arith.truncf %9 : vector<16x8xf32> to vector<16x8xbf16>
    %c0_10 = arith.constant 0 : index
    %c8 = arith.constant 8 : index
    %11 = vector.load %arg7[%c0_10, %c8] : memref<16x32xbf16, #tpu.memory_space<vmem>>, vector<16x8xbf16>
    tpu.vector_store %arg7[%c0_10, %c8], %10 {strides = array<i32>} : memref<16x32xbf16, #tpu.memory_space<vmem>>, vector<16x8xbf16>,
    %c2 = arith.constant 2 : index
    %c0_11 = arith.constant 0 : index
    %c0_12 = arith.constant 0 : index
    %12 = vector.load %arg4[%c2, %c0_11, %c0_12] : memref<4x16x16xbf16, #tpu.memory_space<vmem>>, vector<1x16x16xbf16>
    %13 = vector.shape_cast %12 : vector<1x16x16xbf16> to vector<16x16xbf16>
    %cst_13 = arith.constant dense<0.000000e+00> : vector<16x8xf32>
    %14 = tpu.matmul %13, %1, %cst_13 {dimension_numbers = #tpu.dot_dimension_numbers<[1], [0], [0], [1], [0, 0, 1, 1], [], []>} : vector<16x16xbf16>, vector<16x8xbf16>, vector<16x8xf32> -> vector<16x8xf32>
    %15 = arith.truncf %14 : vector<16x8xf32> to vector<16x8xbf16>
    %c0_14 = arith.constant 0 : index
    %c16 = arith.constant 16 : index
    %16 = vector.load %arg7[%c0_14, %c16] : memref<16x32xbf16, #tpu.memory_space<vmem>>, vector<16x8xbf16>
    tpu.vector_store %arg7[%c0_14, %c16], %15 {strides = array<i32>} : memref<16x32xbf16, #tpu.memory_space<vmem>>, vector<16x8xbf16>,
    %c3 = arith.constant 3 : index
    %c0_15 = arith.constant 0 : index
    %c0_16 = arith.constant 0 : index
    %17 = vector.load %arg4[%c3, %c0_15, %c0_16] : memref<4x16x16xbf16, #tpu.memory_space<vmem>>, vector<1x16x16xbf16>
    %18 = vector.shape_cast %17 : vector<1x16x16xbf16> to vector<16x16xbf16>
    %cst_17 = arith.constant dense<0.000000e+00> : vector<16x8xf32>
    %19 = tpu.matmul %18, %1, %cst_17 {dimension_numbers = #tpu.dot_dimension_numbers<[1], [0], [0], [1], [0, 0, 1, 1], [], []>} : vector<16x16xbf16>, vector<16x8xbf16>, vector<16x8xf32> -> vector<16x8xf32>
    %20 = arith.truncf %19 : vector<16x8xf32> to vector<16x8xbf16>
    %c0_18 = arith.constant 0 : index
    %c24 = arith.constant 24 : index
    %21 = vector.load %arg7[%c0_18, %c24] : memref<16x32xbf16, #tpu.memory_space<vmem>>, vector<16x8xbf16>
    tpu.vector_store %arg7[%c0_18, %c24], %20 {strides = array<i32>} : memref<16x32xbf16, #tpu.memory_space<vmem>>, vector<16x8xbf16>,
    %c0_19 = arith.constant 0 : index
    %c0_20 = arith.constant 0 : index
    %c0_21 = arith.constant 0 : index
    %22 = vector.load %arg2[%c0_19, %c0_20, %c0_21] : memref<1x8x16xbf16, #tpu.memory_space<vmem>>, vector<1x8x16xbf16>
    %23 = vector.shape_cast %22 : vector<1x8x16xbf16> to vector<8x16xbf16>
    %c0_22 = arith.constant 0 : index
    %c0_23 = arith.constant 0 : index
    %24 = vector.load %arg7[%c0_22, %c0_23] : memref<16x32xbf16, #tpu.memory_space<vmem>>, vector<16x32xbf16>
    %cst_24 = arith.constant dense<0.000000e+00> : vector<8x32xf32>
    %25 = tpu.matmul %23, %24, %cst_24 {dimension_numbers = #tpu.dot_dimension_numbers<[1], [0], [0], [1], [0, 0, 1, 1], [], []>} : vector<8x16xbf16>, vector<16x32xbf16>, vector<8x32xf32> -> vector<8x32xf32>
    %26 = arith.index_cast %arg0 : i32 to index
    %27 = memref.load %arg1[%26] : memref<4xf32, #tpu.memory_space<smem>>
    %c0_25 = arith.constant 0 : index
    %c0_26 = arith.constant 0 : index
    %c0_27 = arith.constant 0 : index
    %28 = vector.load %arg5[%c0_25, %c0_26, %c0_27] : memref<1x8x32xf32, #tpu.memory_space<vmem>>, vector<1x8x32xf32>
    %29 = vector.shape_cast %28 : vector<1x8x32xf32> to vector<8x32xf32>
    %30 = vector.broadcast %27 : f32 to vector<8x32xf32>
    %31 = arith.mulf %30, %29 : vector<8x32xf32>
    %32 = arith.addf %25, %31 : vector<8x32xf32>
    %c0_28 = arith.constant 0 : index
    %c0_29 = arith.constant 0 : index
    %c0_30 = arith.constant 0 : index
    %33 = vector.load %arg6[%c0_28, %c0_29, %c0_30] : memref<1x8x32xf32, #tpu.memory_space<vmem>>, vector<1x8x32xf32>
    %34 = vector.shape_cast %33 : vector<1x8x32xf32> to vector<8x32xf32>
    %35 = vector.shape_cast %32 : vector<8x32xf32> to vector<1x8x32xf32>
    tpu.vector_store %arg6[%c0_28, %c0_29, %c0_30], %35 {strides = array<i32>} : memref<1x8x32xf32, #tpu.memory_space<vmem>>, vector<1x8x32xf32>,
    return
  }
  func.func @transform_0(%arg0: i32) -> i32 {
    %c0_i32 = arith.constant 0 : i32
    %c0_i32_0 = arith.constant 0 : i32
    return %c0_i32 : i32
  }
  func.func @transform_1(%arg0: i32) -> (i32, i32, i32) {
    %c0_i32 = arith.constant 0 : i32
    %c0_i32_0 = arith.constant 0 : i32
    %c0_i32_1 = arith.constant 0 : i32
    return %arg0, %c0_i32, %c0_i32_0 : i32, i32, i32
  }
  func.func @transform_2(%arg0: i32) -> (i32, i32, i32) {
    %c0_i32 = arith.constant 0 : i32
    %c0_i32_0 = arith.constant 0 : i32
    %c0_i32_1 = arith.constant 0 : i32
    return %arg0, %c0_i32, %c0_i32_0 : i32, i32, i32
  }
  func.func @transform_3(%arg0: i32) -> (i32, i32, i32) {
    %c0_i32 = arith.constant 0 : i32
    %c0_i32_0 = arith.constant 0 : i32
    %c0_i32_1 = arith.constant 0 : i32
    %c0_i32_2 = arith.constant 0 : i32
    return %c0_i32, %c0_i32_0, %c0_i32_1 : i32, i32, i32
  }
  func.func @transform_4(%arg0: i32) -> (i32, i32, i32) {
    %c0_i32 = arith.constant 0 : i32
    %c0_i32_0 = arith.constant 0 : i32
    %c0_i32_1 = arith.constant 0 : i32
    return %arg0, %c0_i32, %c0_i32_0 : i32, i32, i32
  }
  func.func @transform_5(%arg0: i32) -> (i32, i32, i32) {
    %c0_i32 = arith.constant 0 : i32
    %c0_i32_0 = arith.constant 0 : i32
    %c0_i32_1 = arith.constant 0 : i32
    return %arg0, %c0_i32, %c0_i32_0 : i32, i32, i32
  }
}

</mosaic_0001>

<bundles_post_ra>
// kernel: tpu_custom_call.1
= control target key start
LH: loop header
LB: loop body
LE: loop exit
PB: predicated region body
PF: predicated region fallthrough
CT: control target
= control target key end

     0   :  { %10 = vsyncpa [#allocation6], 0  ;;  %s1270_s0 = inlined_call_operand.vmem [shape: f32[4], index: 0, kind: input, shape index: {}]   ;;  %s1271_s1 = inlined_call_operand.vmem [shape: bf16[4,8,16], index: 1, kind: input, shape index: {}]   ;;  %s1272_s2 = inlined_call_operand.vmem [shape: bf16[4,16,8], index: 2, kind: input, shape index: {}]   ;;  %s1273_s3 = inlined_call_operand.vmem [shape: bf16[4,16,16], index: 3, kind: input, shape index: {}]   ;;  %s1274_s4 = inlined_call_operand.hbm [shape: f32[4,8,32], index: 4, kind: input, shape index: {}]   ;;  %s1275_s5 = inlined_call_operand.hbm [shape: f32[4,8,32], index: 5, kind: output, shape index: {}]  }
   0x1   :  { %11 = vsyncpa [#allocation4], 0 }
   0x2   :  { %13 = vsyncpa [#allocation4 + $0x1], 0 }
   0x3   :  { %14 = vsyncpa [#allocation5], 0 }
   0x4   :  { %16 = vsyncpa [#allocation5 + $0x1], 0  ;;  %s1052_s18 = smov 0   ;;  %s1054_s19 = smov 0  }
   0x5   :  { %s1056_s20 = smov 0   ;;  %s1058_s21 = smov 0  }
   0x6 LB: > { %s1073_s22 = sadd.s32 4294967295, %s1012_s21   ;;  %s742_s23 = sadd.s32 4294967294, %s1012_s21   ;;  %s1012_s21 = sphi %s1058_s21, %s1297_s21   ;;  %s1008_s20 = sphi %s1056_s20, %s1296_s20   ;;  %s1004_s19 = sphi %s1054_s19, %s1295_s19   ;;  %s1000_s18 = sphi %s1052_s18, %s1294_s18  }
   0x7   : > { %p136_p0 = scmp.ne.s32.totalorder %s1004_s19, %s1000_s18  ;;  %p1276_p1 = scmp.eq.s32.totalorder %s1073_s22, 0 }
   0x8   : > { %p166_p3 = scmp.eq.s32.totalorder %s742_s23, 3  ;;  %p743_p5 = scmp.ge.s32.totalorder %s1012_s21, 1 }
   0x9   : > { %p1082_p4 = por %p1276_p1, %p136_p0  ;;  %p173_p7 = scmp.lt.s32.totalorder %s1012_s21, 5 }
   0xa   : > { %p1087_p6 = por %p166_p3, %p136_p0  ;;  %s186_s28 = sshll.u32 %s1270_s0, 4  ;;  %s187_s28 = int_to_ptr.vmem [resolvable:$true] %s186_s28 }
   0xb   : > { %s1280_s24 = scalar_select %p1082_p4, 1, 0 }
   0xc   : > { %s1281_s25 = scalar_select %p1087_p6, 1, 0 }
   0xd   : > { %p1095_p8 = pnand %p743_p5, %p173_p7  ;;  %s1102_s30 = sadd.s32 1, %s1012_s21  }
   0xe   : > { %s120_s7 = ssub.s32 %s1012_s21, %s1102_s30  ;;  %s123_s9 = sadd.s32 1, %s1008_s20 }
   0xf   : > { %s1282_s29 = scalar_select %p1095_p8, 1, 0 }
  0x10   : > { %p841_p9 = pneg %p1095_p8  ;;  %p1112_p11 = scmp.eq.s32.totalorder %s120_s7, 0 }
  0x11   : > { %p130_p12 = scmp.ne.s32.totalorder %s1008_s20, %s1004_s19  ;;  %s901_s10 = scalar_lea.vmem %s187_s28, 16 }
  0x12   : > { %p1106_p10 = pnand %p841_p9, %p1276_p1  ;;  %p902_p13 = scmp.ne.s32.totalorder %s187_s28, %s901_s10 }
  0x13   : > { %p909_p7 = scmp.lt.s32.totalorder %s187_s28, %s187_s28  ;;  %p910_p2 = scmp.lt.s32.totalorder %s901_s10, %s901_s10 }
  0x14   : > { %p903_p0 = pneg %p1106_p10 }
  0x15   : > { %p911_p9 = por %p910_p2, %p909_p7 }
  0x16   : > { %p904_p3 = pnand %p903_p0, %p902_p13 }
  0x18   : > { %p905_p5 = pneg %p904_p3 }
  0x1a   : > { %p912_p1 = pnand %p911_p9, %p905_p5 }
  0x1c   : > { %915 = shalt.err (!%p912_p1)
}
  0x1d   : > { %s1014_s11 = smov [#allocation3]   ;;  %p131_p2 = scmp.eq.s32.totalorder %s1012_s21, 0 }
  0x1e   : > { %844 = dma.vmem_to_smem (!%p1106_p10), %s187_s28, 16, %s1014_s11, [#allocation6]  }
  0x1f   : > { %s1126_s12 = scalar_select %p1112_p11, %s1008_s20, %s123_s9  }
  0x20   : > { %p1285_p1 = scmp.eq.s32.totalorder %s1073_s22, 3  ;;  %p854_p0 = scmp.lt.s32.totalorder %s1012_s21, 4 }
  0x21   : > { %s215_s14 = sand.u32 1, %s1008_s20   ;;  %p132_p3 = por %p131_p2, %p130_p12 }
  0x22   : > { %p1134_p13 = por %p1285_p1, %p130_p12  ;;  %s746_s15 = sshll.u32 %s215_s14, 3 }
  0x23   : > { %s747_s16 = sshll.u32 %s1012_s21, 7  ;;  %s219_s27 = scalar_lea.vmem [#allocation7], %s746_s15 }
  0x24   : > { %s1286_s13 = scalar_select %p1134_p13, 1, 0 }
  0x25   : > { %s1147_s26 = scalar_lea.hbm %s1274_s4, %s747_s16  ;;  %s226_s28 = sshll.u32 %s219_s27, 4  ;;  %s227_s28 = int_to_ptr.vmem [resolvable:$true] %s226_s28 }
  0x26   : > { %p1149_p10 = pnand %p854_p0, %p132_p3  ;;  %s216_s7 = scalar_lea.sflag [#allocation4], %s215_s14 }
  0x27   : > { %s916_s8 = scalar_lea.hbm %s1147_s26, 128  ;;  %s921_s11 = scalar_lea.hbm %s1274_s4, 512 }
  0x28   : > { %p917_p11 = scmp.ne.s32.totalorder %s1147_s26, %s916_s8  ;;  %p918_p12 = pneg %p1149_p10 }
  0x29   : > { %p922_p9 = scmp.lt.s32.totalorder %s1147_s26, %s1274_s4  ;;  %p923_p2 = scmp.lt.s32.totalorder %s921_s11, %s916_s8 }
  0x2a   : > { %p919_p5 = pnand %p918_p12, %p917_p11 }
  0x2b   : > { %p924_p1 = por %p923_p2, %p922_p9 }
  0x2c   : > { %p920_p7 = pneg %p919_p5 }
  0x2e   : > { %p925_p0 = pnand %p924_p1, %p920_p7 }
  0x30   : > { %928 = shalt.err (!%p925_p0)
}
  0x31   : > { %s929_s17 = scalar_lea.vmem %s227_s28, 128  ;;  %s1015_s14 = smov [#allocation7]  }
  0x32   : > { %p930_p3 = scmp.ne.s32.totalorder %s227_s28, %s929_s17  ;;  %s934_s23 = sshll.u32 %s1015_s14, 4  ;;  %s935_s23 = int_to_ptr.vmem [resolvable:$false] %s934_s23 }
  0x33   : > { %s936_s27 = scalar_lea.vmem %s935_s23, 256  ;;  %p937_p11 = scmp.lt.s32.totalorder %s227_s28, %s935_s23 }
  0x34   : > { %p932_p6 = pnand %p930_p3, %p918_p12  ;;  %p938_p5 = scmp.lt.s32.totalorder %s936_s27, %s929_s17 }
  0x36   : > { %p933_p13 = pneg %p932_p6  ;;  %p939_p4 = por %p938_p5, %p937_p11 }
  0x38   : > { %p940_p8 = pnand %p939_p4, %p933_p13 }
  0x3a   : > { %943 = shalt.err (!%p940_p8)
}
  0x3b   : > { %848 = dma.hbm_to_vmem [thread:$0]  (!%p1149_p10), %s1147_s26, 128, %s227_s28, %s216_s7  }
  0x3c   : > { %p1288_p7 = scmp.ne.s32.totalorder %s1282_s29, 0 }
  0x3d   : > { %p1289_p9 = scmp.eq.s32.totalorder (!%p1288_p7), %s1073_s22, 0 }
  0x3e   : > { %235 = sbr.rel (%p1288_p7) target bundleno = 630 (0x276), region = 40 }
  0x43   : > { %987 = dma.done.wait (%p1289_p9), [#allocation6], 16   ;;  %p1290_p6 = pmov %p1289_p9 }
  0x44   : > { %s1174_s8 = sand.u32 1, %s1004_s19   ;;  %p1291_p4 = scmp.ne.s32.totalorder %s1280_s24, 0 }
  0x45   : > { %989 = vsyncadd (%p1290_p6), [#allocation6], 4294967280  ;;  %s750_s9 = sshll.u32 %s1174_s8, 3  ;;  %s242_s6 = scalar_lea.sflag [#allocation4], %s1174_s8 }
  0x46   : > { %s1180_s26 = scalar_lea.vmem [#allocation7], %s750_s9 }
  0x47   : > { %991 = dma.done.wait (%p1291_p4), %s242_s6, 128  }
  0x48   : > { %993 = vsyncadd (%p1291_p4), %s242_s6, 4294967168 }
  0x49   : > { %250 = sfence }
  0x4a   : > { %p282_p8 = scmp.lt.s32.totalorder %s1073_s22, 3  ;;  %v1016_v0 = vmov 0.0   ;;  %vm1017_vm0 = vmmov 0   ;;  %v896_v2 = vld [vmem:[%s1273_s3] sm:$0xff]   ;;  %v897_v3 = vld [vmem:[%s1273_s3 + $0x8] sm:$0xff]   ;;  %vm307_vm1 = vcmask 130048  }
  0x4b   : > { %803 = vmatprep.subr.bf16.mxu0 %v1016_v0  ;;  %809 = vmatprep.subr.bf16.mxu1 %v1016_v0  ;;  %v898_v4 = vld [vmem:[%s1273_s3 + $0x10] sm:$0xff]   ;;  %v899_v5 = vld [vmem:[%s1273_s3 + $0x18] sm:$0xff]   ;;  %vm360_vm2 = vcmask 60416   ;;  %s1019_s7 = smov 16   ;;  %s1020_s10 = smov 24   ;;  %vm427_vm3 = vcmask 126016  }
  0x4c   : > { %s1188_s29 = scalar_select %p282_p8, %s1073_s22, 3  ;;  %805 = vmatprep.mubr.msk.bf16.mxu0 %vm1017_vm0, %v1016_v0  ;;  %811 = vmatprep.mubr.msk.bf16.mxu1 %vm1017_vm0, %v1016_v0  ;;  %vm494_vm4 = vcmask 191616   ;;  %vm561_vm5 = vcmask 257216   ;;  %v568_v38 = vld [vmem:[%s1180_s26] sm:$0xff]  ;;  %vm620_vm6 = vcmask 261120  }
  0x4d   : > { %s567_s17 = sld [smem:[#allocation3 + %s1073_s22]]  ;;  %s781_s14 = sshll.u32 %s1073_s22, 7 }
  0x4e   : > { %s784_s28 = sshll.u32 %s1188_s29, 3  ;;  %s281_s23 = scalar_lea.vmem [#allocation8], %s750_s9 }
  0x4f   : > { %s290_s24 = scalar_lea.vmem %s1272_s2, %s784_s28  ;;  %s1018_s28 = smov 8  }
  0x50   : > { %v895_v1 = vld [vmem:[%s290_s24] sm:$0xff]   ;;  %s752_s24 = sshll.u32 %s1188_s29, 2  ;;  %s636_s27 = sshll.u32 %s281_s23, 4  ;;  %s1230_s27 = int_to_ptr.vmem [resolvable:$true] %s636_s27 }
  0x51   : > { %804 = vmatpush3.bf16.msra.mxu0 %v895_v1  ;;  %810 = vmatpush3.bf16.msra.mxu1 %v895_v1  ;;  %s285_s15 = scalar_lea.vmem %s1271_s1, %s752_s24  ;;  %s623_s22 = scalar_lea.sflag [#allocation5], %s1174_s8 }
  0x52   : > { %815 = vmatprep.subr.bf16.mxu0 %v1016_v0  ;;  %821 = vmatprep.subr.bf16.mxu1 %v1016_v0  ;;  %v564_v37 = vld [vmem:[%s285_s15] sm:$0xf]  ;;  %s944_s26 = scalar_lea.vmem %s1230_s27, 128  ;;  %p1292_p10 = scmp.ne.s32.totalorder %s1286_s13, 0 }
  0x53   : > { %v569_v39 = vstv %s567_s17  ;;  %p945_p13 = scmp.ne.s32.totalorder %s1230_s27, %s944_s26  ;;  %s1021_s9 = smov [#allocation8]  }
  0x54   : > { %806 = vmatmul.mubr.msk.bf16.vlgmr.msra.gmra.mxu0 %vm307_vm1, %v896_v2  ;;  %812 = vmatmul.mubr.msk.bf16.vlgmr.msra.gmra.mxu1 %vm307_vm1, %v897_v3  ;;  %v570_v40 = vmul.f32 %v569_v39, %v568_v38 }
  0x55   : > { %816 = vmatpush3.bf16.msra.mxu0 %v895_v1  ;;  %822 = vmatpush3.bf16.msra.mxu1 %v895_v1  ;;  %p946_p12 = pnand %p945_p13, %p1292_p10 }
  0x56   : > { %817 = vmatprep.mubr.msk.bf16.mxu0 %vm1017_vm0, %v1016_v0  ;;  %823 = vmatprep.mubr.msk.bf16.mxu1 %vm1017_vm0, %v1016_v0 }
  0x57   : > { %827 = vmatprep.subr.bf16.mxu0 %v1016_v0  ;;  %p947_p2 = pneg %p946_p12 }
  0x5c   : > { %818 = vmatmul.mubr.msk.bf16.vlgmr.msra.gmra.mxu0 %vm307_vm1, %v898_v4  ;;  %824 = vmatmul.mubr.msk.bf16.vlgmr.msra.gmra.mxu1 %vm307_vm1, %v899_v5 }
  0x5d   : > { %829 = vmatprep.mubr.msk.bf16.mxu0 %vm1017_vm0, %v1016_v0 }
 0x114   : > { %v345_v6 = vpop.f32.mrf.mxu0  ;;  %v408_v7 = vpop.f32.mrf.mxu1 }
 0x115   : > { %v785_v8 = vpack.c.bf16 %v345_v6, %v345_v6  ;;  %v787_v9 = vpack.c.bf16 %v408_v7, %v408_v7 }
 0x116   : > { %v807_v10 = vpop.f32.mrf.mxu0  ;;  %v813_v11 = vpop.f32.mrf.mxu1 }
 0x117   : > { %361 = vst.msk [vmem:[#allocation2] sm:$0xf] %vm360_vm2, %v785_v8  ;;  %421 = vrot.lane.b32.xlu0 %v787_v9, %s1018_s28 }
 0x118   : > { %v348_v12 = vpop.f32.mrf.mxu0  ;;  %v411_v13 = vpop.f32.mrf.mxu1 }
 0x119   : > { %v786_v14 = vpack.c.bf16 %v348_v12, %v348_v12  ;;  %v788_v15 = vpack.c.bf16 %v411_v13, %v411_v13 }
 0x11a   : > { %v808_v16 = vpop.f32.mrf.mxu0  ;;  %v814_v17 = vpop.f32.mrf.mxu1 }
 0x11b   : > { %362 = vst.msk [vmem:[#allocation2 + $0x4] sm:$0xf] %vm360_vm2, %v786_v14  ;;  %423 = vrot.lane.b32.xlu0 %v788_v15, %s1018_s28  ;;  %s1228_s28 = scalar_lea.hbm %s1275_s5, %s781_s14 }
 0x11c   : > { %v475_v18 = vpop.f32.mrf.mxu0  ;;  %v542_v19 = vpop.f32.mrf.mxu1 }
 0x11d   : > { %v789_v20 = vpack.c.bf16 %v475_v18, %v475_v18  ;;  %v791_v21 = vpack.c.bf16 %v542_v19, %v542_v19 }
 0x11e   : > { %v819_v22 = vpop.f32.mrf.mxu0  ;;  %v825_v23 = vpop.f32.mrf.mxu1 }
 0x11f   : > { %488 = vrot.lane.b32.xlu1 %v789_v20, %s1019_s7  ;;  %555 = vrot.lane.b32.xlu0 %v791_v21, %s1020_s10 }
 0x120   : > { %v478_v24 = vpop.f32.mrf.mxu0  ;;  %v545_v25 = vpop.f32.mrf.mxu1 }
 0x121   : > { %v790_v26 = vpack.c.bf16 %v478_v24, %v478_v24  ;;  %v792_v29 = vpack.c.bf16 %v545_v25, %v545_v25 }
 0x122   : > { %v820_v27 = vpop.f32.mrf.mxu0  ;;  %v826_v28 = vpop.f32.mrf.mxu1 }
 0x123   : > { %490 = vrot.lane.b32.xlu1 %v790_v26, %s1019_s7  ;;  %s948_s7 = sshll.u32 %s1021_s9, 4  ;;  %s949_s7 = int_to_ptr.vmem [resolvable:$false] %s948_s7 }
 0x124   : > { %p951_p1 = scmp.lt.s32.totalorder %s1230_s27, %s949_s7 }
 0x127   : > { %557 = vrot.lane.b32.xlu1 %v792_v29, %s1020_s10  ;;  %s950_s10 = scalar_lea.vmem %s949_s7, 256 }
 0x128   : > { %p952_p0 = scmp.lt.s32.totalorder %s950_s10, %s944_s26 }
 0x12a   : > { %p953_p3 = por %p952_p0, %p951_p1 }
 0x12c   : > { %p954_p11 = pnand %p953_p3, %p947_p2 }
 0x189   : > { %v422_v30 = vpop.permute.xlu0 %421 }
 0x18a   : > { %428 = vst.msk [vmem:[#allocation2] sm:$0xf] %vm427_vm3, %v422_v30 }
 0x18d   : > { %v424_v31 = vpop.permute.xlu0 %423 }
 0x18e   : > { %429 = vst.msk [vmem:[#allocation2 + $0x4] sm:$0xf] %vm427_vm3, %v424_v31 }
 0x191   : > { %v489_v32 = vpop.permute.xlu1 %488  ;;  %v556_v33 = vpop.permute.xlu0 %555 }
 0x192   : > { %495 = vst.msk [vmem:[#allocation2] sm:$0xf] %vm494_vm4, %v489_v32 }
 0x193   : > { %562 = vst.msk [vmem:[#allocation2] sm:$0xf] %vm561_vm5, %v556_v33 }
 0x195   : > { %v491_v34 = vpop.permute.xlu1 %490 }
 0x196   : > { %496 = vst.msk [vmem:[#allocation2 + $0x4] sm:$0xf] %vm494_vm4, %v491_v34 }
 0x199   : > { %v558_v35 = vpop.permute.xlu1 %557 }
 0x19a   : > { %563 = vst.msk [vmem:[#allocation2 + $0x4] sm:$0xf] %vm561_vm5, %v558_v35 }
 0x1a1   : > { %v900_v36 = vld [vmem:[#allocation2] sm:$0xff]  }
 0x1a2   : > { %828 = vmatpush3.bf16.msra.mxu0 %v900_v36 }
 0x1a5   : > { %830 = vmatmul.mubr.msk.bf16.vlgmr.msra.gmra.mxu0 %vm307_vm1, %v564_v37 }
 0x265   : > { %v614_v41 = vpop.f32.mrf.mxu0 }
 0x266   : > { %v615_v42 = vadd.f32 %v614_v41, %v570_v40 }
 0x267   : > { %v831_v43 = vpop.f32.mrf.mxu0 }
 0x268   : > { %621 = vst.msk [vmem:[%s281_s23] sm:$0xff] %vm620_vm6, %v615_v42 }
 0x269   : > { %v617_v44 = vpop.f32.mrf.mxu0 }
 0x26a   : > { %957 = shalt.err (!%p954_p11)
}
 0x26b   : > { %s958_s24 = scalar_lea.hbm %s1228_s28, 128  ;;  %s962_s16 = scalar_lea.hbm %s1275_s5, 512 }
 0x26c   : > { %p959_p5 = scmp.ne.s32.totalorder %s1228_s28, %s958_s24  ;;  %p963_p6 = scmp.lt.s32.totalorder %s1228_s28, %s1275_s5 }
 0x26d   : > { %p964_p4 = scmp.lt.s32.totalorder %s962_s16, %s958_s24 }
 0x26e   : > { %p960_p7 = pnand %p959_p5, %p1292_p10 }
 0x26f   : > { %p965_p8 = por %p964_p4, %p963_p6 }
 0x270   : > { %p961_p9 = pneg %p960_p7 }
 0x272   : > { %p966_p13 = pnand %p965_p8, %p961_p9 }
 0x274   : > { %969 = shalt.err (!%p966_p13)
}
 0x275   : > { %839 = dma.vmem_to_hbm [thread:$0]  (%p1292_p10), %s1230_s27, 128, %s1228_s28, %s623_s22   ;;  %v832_v45 = vpop.f32.mrf.mxu0 }
 0x276 PF: > { %p856_p12 = scmp.ge.s32.totalorder %s1012_s21, 2  ;;  %s648_s14 = sand.u32 1, %s1000_s18  }
 0x277   : > { %p1293_p2 = scmp.ne.s32.totalorder %s1281_s25, 0  ;;  %s649_s23 = scalar_lea.sflag [#allocation5], %s648_s14 }
 0x279   : > { %p850_p1 = pnand %p856_p12, %p1293_p2 }
 0x27b   : > { %p851_p0 = pneg %p850_p1 }
 0x27d   : > { %995 = dma.done.wait (%p851_p0), %s649_s23, 128  }
 0x27e   : > { %997 = vsyncadd (%p851_p0), %s649_s23, 4294967168  ;;  %p19_p3 = scmp.ge.s32.totalorder %s1102_s30, 6   ;;  %s1294_s18 = smov %s1004_s19 }
 0x27f   : > { %s1295_s19 = smov %s1008_s20  ;;  %s1296_s20 = smov %s1126_s12 }
 0x280   : > { %s1297_s21 = smov %s1102_s30  ;;  %21 = sbr.rel (!%p19_p3) target bundleno = 6 (0x6), region = 99 }
 0x285   :  { %654 = vsyncpa [#allocation4], 1 }
 0x286   :  { %656 = vsyncpa [#allocation4 + $0x1], 1 }
 0x287   :  { %657 = vsyncpa [#allocation5], 1 }
 0x288   :  { %659 = vsyncpa [#allocation5 + $0x1], 1 }
 0x289   :  { %660 = vsyncpa [#allocation6], 1 }
 0x28a   :  { %662 = vsyncpa [#allocation6 + $0x1], 1 }

</bundles_post_ra>
